<compile_context>
chip_gen: v6e
topology: v6e:2x2x1
jax: 0.10.0
libtpu: 0.0.40
codegen_flags: <defaults>
</compile_context>

<pallas_src>
import functools

import jax
import jax.numpy as jnp
from jax.experimental import pallas as pl
from jax.experimental.pallas import tpu as pltpu


def _round_up(x, m):
    return (x + m - 1) // m * m


def _pack_params(params):
    """Pack all (W, b) pairs into one row-stacked f32 buffer.

    Layout (row offsets are multiples of 8 so in-kernel slices stay
    sublane-aligned):
        [ W0 padded to ceil8(in0) rows ][ b0 in row 0 of an 8-row block ]
        [ W1 ... ][ b1 ... ] ...
    Width = max out_dim over layers.  Returns (packed, layout) where layout
    is a static tuple of (w_row, b_row, in_dim, out_dim) per layer.
    """
    width = max(int(w.shape[1]) for w, _ in params)
    segs = []
    layout = []
    row = 0
    for w, b in params:
        in_dim, out_dim = int(w.shape[0]), int(w.shape[1])
        w_rows = _round_up(in_dim, 8)
        w_pad = (jnp.zeros((w_rows, width), jnp.float32)
                 .at[:in_dim, :out_dim].set(w.astype(jnp.float32)))
        b_pad = (jnp.zeros((8, width), jnp.float32)
                 .at[0, :out_dim].set(b.astype(jnp.float32).reshape(-1)))
        layout.append((row, row + w_rows, in_dim, out_dim))
        segs.append(w_pad)
        segs.append(b_pad)
        row += w_rows + 8
    packed = jnp.concatenate(segs, axis=0)
    return packed, tuple(layout)


def _mae_mlp_kernel(idx_ref, row_ref, params_ref, o_ref, *, layout,
                    negative_slope):
    """One batch row per grid step: gathered row -> (Linear, LeakyReLU)* -> Linear."""
    del idx_ref  # consumed by the index_maps (scalar prefetch), not the body
    n_layers = len(layout)
    x = row_ref[0].astype(jnp.float32)                       # (1, D0) == data.float()[idx]
    for li, (w_row, b_row, in_dim, out_dim) in enumerate(layout):
        w = params_ref[w_row:w_row + in_dim, 0:out_dim]      # (in, out), static slice
        b = params_ref[b_row:b_row + 1, 0:out_dim]           # (1, out)
        x = jnp.dot(x, w, preferred_element_type=jnp.float32) + b
        if li != n_layers - 1:
            x = jnp.maximum(x, negative_slope * x)           # LeakyReLU(0.1)
    o_ref[0] = x.astype(o_ref.dtype)


def mae_mlp_forward(data, sample_index_i, params, *, negative_slope=0.1):
    """Pallas implementation of MAE_MLP.forward(sample_index_i)."""
    n_points, d0 = int(data.shape[0]), int(data.shape[1])
    batch = int(sample_index_i.shape[0])
    out_dim = int(params[-1][0].shape[1])

    # PyTorch indexing wraps negatives and raises on OOB; we wrap negatives
    # and clamp so the row-gather DMA always stays in bounds.
    idx = sample_index_i.astype(jnp.int32)
    idx = jnp.where(idx < 0, idx + n_points, idx)
    idx = jnp.clip(idx, 0, n_points - 1)

    packed, layout = _pack_params(params)
    packed_shape = tuple(int(s) for s in packed.shape)

    # 3-D views so every block's last two dims equal the full array dims
    # (trivially legal tiling); leading dim is the gather / batch axis.
    data3 = data.reshape(n_points, 1, d0)

    kernel = functools.partial(_mae_mlp_kernel, layout=layout,
                               negative_slope=negative_slope)

    flops = sum(2 * batch * in_dim * od for (_, _, in_dim, od) in layout)
    bytes_accessed = (batch * d0 * data.dtype.itemsize   # gathered rows only
                      + int(packed.size) * 4             # packed params (once)
                      + batch * 4                        # indices (SMEM)
                      + batch * out_dim * 4)             # output

    out3 = pl.pallas_call(
        kernel,
        out_shape=jax.ShapeDtypeStruct((batch, 1, out_dim), jnp.float32),
        grid_spec=pltpu.PrefetchScalarGridSpec(
            num_scalar_prefetch=1,
            grid=(batch,),
            in_specs=[
                # Data-dependent row gather: block index along dim 0 is the
                # prefetched sample index (block size 1 => element offset).
                pl.BlockSpec((1, 1, d0), lambda i, idx_ref: (idx_ref[i], 0, 0)),
                # Single packed weight/bias buffer, constant index_map => one
                # DMA, resident in VMEM across the whole batch grid.
                pl.BlockSpec(packed_shape, lambda i, idx_ref: (0, 0)),
            ],
            out_specs=pl.BlockSpec((1, 1, out_dim),
                                   lambda i, idx_ref: (i, 0, 0)),
        ),
        compiler_params=pltpu.CompilerParams(
            dimension_semantics=("parallel",),      # batch rows independent
            vmem_limit_bytes=16 * 1024 * 1024,      # tiny footprint; portable
        ),
        cost_estimate=pl.CostEstimate(
            flops=flops, transcendentals=0, bytes_accessed=bytes_accessed),
    )(idx, data3, packed)

    return out3.reshape(batch, out_dim)


def init_mlp_params(key, network_structure):
    """PyTorch-Linear-style init: U(-1/sqrt(fan_in), 1/sqrt(fan_in)).

    Weights are stored transposed relative to PyTorch, i.e. (in_dim, out_dim),
    so each layer is y = x @ W + b (same math as nn.Linear's x @ W.T + b).
    """
    params = []
    for i in range(len(network_structure) - 1):
        in_dim = network_structure[i]
        out_dim = network_structure[i + 1]
        key, kw, kb = jax.random.split(key, 3)
        bound = 1.0 / jnp.sqrt(jnp.float32(in_dim))
        w = jax.random.uniform(
            kw, (in_dim, out_dim), jnp.float32, minval=-bound, maxval=bound)
        b = jax.random.uniform(
            kb, (out_dim,), jnp.float32, minval=-bound, maxval=bound)
        params.append((w, b))
    return params


if __name__ == "__main__":
    key = jax.random.PRNGKey(0)

    # Small shapes consistent with the module: dataset of 32 points with
    # feature dim 16 (= NetworkStructure[0]); MLP 16 -> 32 -> 32 -> 2.
    network_structure = [16, 32, 32, 2]
    n_points = 32
    batch = 8

    key, kdata, kidx = jax.random.split(key, 3)
    data = jax.random.normal(kdata, (n_points, network_structure[0]), jnp.float32)
    sample_index_i = jax.random.randint(kidx, (batch,), 0, n_points, jnp.int32)

    params = init_mlp_params(jax.random.PRNGKey(42), network_structure)

    fwd = jax.jit(mae_mlp_forward)
    out = jax.block_until_ready(fwd(data, sample_index_i, params))

    # Pure-JAX reference of the same computation (nn.Linear + LeakyReLU(0.1)).
    x_ref = data.astype(jnp.float32)[sample_index_i]
    for i, (w, b) in enumerate(params):
        x_ref = x_ref @ w + b
        if i != len(params) - 1:
            x_ref = jnp.where(x_ref > 0, x_ref, 0.1 * x_ref)

    assert out.shape == (batch, network_structure[-1])
    assert jnp.allclose(out, x_ref, atol=1e-5, rtol=1e-5)

    # TODO(synk): only forward() is implemented; the loss-side methods (KO,
    # kNNGraph, DistanceLoss, RankLoss, Distance_squared) are not part of the
    # forward pass.
    print("KERNEL_OK")
</pallas_src>

<mosaic_0001>
module attributes {stable_mosaic.version = 11 : i64} {
  func.func @_mae_mlp_kernel(%arg0: i32, %arg1: memref<8xi32, #tpu.memory_space<smem>>, %arg2: memref<1x1x16xf32, #tpu.memory_space<vmem>>, %arg3: memref<104x32xf32, #tpu.memory_space<vmem>>, %arg4: memref<1x1x2xf32, #tpu.memory_space<vmem>>) attributes {dimension_semantics = [#tpu.dimension_semantics<parallel>], iteration_bounds = array<i64: 8>, scalar_prefetch = 1 : i64, scratch_operands = 0 : i64, tpu.core_type = #tpu.core_type<tc>, window_params = [{transform_indices = @transform_0, window_bounds = array<i64: 1, 1, 16>}, {pipeline_mode = #tpu.pipeline_mode<synchronous>, transform_indices = @transform_1, window_bounds = array<i64: 104, 32>}, {transform_indices = @transform_2, window_bounds = array<i64: 1, 1, 2>}]} {
    %c0 = arith.constant 0 : index
    %c0_0 = arith.constant 0 : index
    %c0_1 = arith.constant 0 : index
    %0 = vector.load %arg2[%c0, %c0_0, %c0_1] : memref<1x1x16xf32, #tpu.memory_space<vmem>>, vector<1x1x16xf32>
    %1 = vector.shape_cast %0 : vector<1x1x16xf32> to vector<1x16xf32>
    %c0_2 = arith.constant 0 : index
    %c0_3 = arith.constant 0 : index
    %2 = vector.load %arg3[%c0_2, %c0_3] : memref<104x32xf32, #tpu.memory_space<vmem>>, vector<16x32xf32>
    %c16 = arith.constant 16 : index
    %c0_4 = arith.constant 0 : index
    %3 = vector.load %arg3[%c16, %c0_4] : memref<104x32xf32, #tpu.memory_space<vmem>>, vector<1x32xf32>
    %cst = arith.constant dense<0.000000e+00> : vector<1x32xf32>
    %4 = tpu.matmul %1, %2, %cst {dimension_numbers = #tpu.dot_dimension_numbers<[1], [0], [0], [1], [0, 0, 1, 1], [], []>} : vector<1x16xf32>, vector<16x32xf32>, vector<1x32xf32> -> vector<1x32xf32>
    %5 = arith.addf %4, %3 : vector<1x32xf32>
    %cst_5 = arith.constant 1.000000e-01 : f32
    %6 = vector.broadcast %cst_5 : f32 to vector<1x32xf32>
    %7 = arith.mulf %6, %5 : vector<1x32xf32>
    %8 = arith.maximumf %5, %7 : vector<1x32xf32>
    %c24 = arith.constant 24 : index
    %c0_6 = arith.constant 0 : index
    %9 = vector.load %arg3[%c24, %c0_6] : memref<104x32xf32, #tpu.memory_space<vmem>>, vector<32x32xf32>
    %c56 = arith.constant 56 : index
    %c0_7 = arith.constant 0 : index
    %10 = vector.load %arg3[%c56, %c0_7] : memref<104x32xf32, #tpu.memory_space<vmem>>, vector<1x32xf32>
    %cst_8 = arith.constant dense<0.000000e+00> : vector<1x32xf32>
    %11 = tpu.matmul %8, %9, %cst_8 {dimension_numbers = #tpu.dot_dimension_numbers<[1], [0], [0], [1], [0, 0, 1, 1], [], []>} : vector<1x32xf32>, vector<32x32xf32>, vector<1x32xf32> -> vector<1x32xf32>
    %12 = arith.addf %11, %10 : vector<1x32xf32>
    %cst_9 = arith.constant 1.000000e-01 : f32
    %13 = vector.broadcast %cst_9 : f32 to vector<1x32xf32>
    %14 = arith.mulf %13, %12 : vector<1x32xf32>
    %15 = arith.maximumf %12, %14 : vector<1x32xf32>
    %c64 = arith.constant 64 : index
    %c0_10 = arith.constant 0 : index
    %16 = vector.load %arg3[%c64, %c0_10] : memref<104x32xf32, #tpu.memory_space<vmem>>, vector<32x2xf32>
    %c96 = arith.constant 96 : index
    %c0_11 = arith.constant 0 : index
    %17 = vector.load %arg3[%c96, %c0_11] : memref<104x32xf32, #tpu.memory_space<vmem>>, vector<1x2xf32>
    %cst_12 = arith.constant dense<0.000000e+00> : vector<1x2xf32>
    %18 = tpu.matmul %15, %16, %cst_12 {dimension_numbers = #tpu.dot_dimension_numbers<[1], [0], [0], [1], [0, 0, 1, 1], [], []>} : vector<1x32xf32>, vector<32x2xf32>, vector<1x2xf32> -> vector<1x2xf32>
    %19 = arith.addf %18, %17 : vector<1x2xf32>
    %c0_13 = arith.constant 0 : index
    %c0_14 = arith.constant 0 : index
    %c0_15 = arith.constant 0 : index
    %20 = vector.load %arg4[%c0_13, %c0_14, %c0_15] : memref<1x1x2xf32, #tpu.memory_space<vmem>>, vector<1x1x2xf32>
    %21 = vector.shape_cast %20 : vector<1x1x2xf32> to vector<1x2xf32>
    %22 = vector.shape_cast %19 : vector<1x2xf32> to vector<1x1x2xf32>
    tpu.vector_store %arg4[%c0_13, %c0_14, %c0_15], %22 {strides = array<i32>} : memref<1x1x2xf32, #tpu.memory_space<vmem>>, vector<1x1x2xf32>,
    return
  }
  func.func @transform_0(%arg0: i32, %arg1: memref<8xi32, #tpu.memory_space<smem>>) -> (i32, i32, i32) {
    %0 = arith.index_cast %arg0 : i32 to index
    %1 = memref.load %arg1[%0] : memref<8xi32, #tpu.memory_space<smem>>
    %c0_i32 = arith.constant 0 : i32
    %c0_i32_0 = arith.constant 0 : i32
    %c0_i32_1 = arith.constant 0 : i32
    return %1, %c0_i32, %c0_i32_0 : i32, i32, i32
  }
  func.func @transform_1(%arg0: i32, %arg1: memref<8xi32, #tpu.memory_space<smem>>) -> (i32, i32) {
    %c0_i32 = arith.constant 0 : i32
    %c0_i32_0 = arith.constant 0 : i32
    %c0_i32_1 = arith.constant 0 : i32
    return %c0_i32, %c0_i32_0 : i32, i32
  }
  func.func @transform_2(%arg0: i32, %arg1: memref<8xi32, #tpu.memory_space<smem>>) -> (i32, i32, i32) {
    %c0_i32 = arith.constant 0 : i32
    %c0_i32_0 = arith.constant 0 : i32
    %c0_i32_1 = arith.constant 0 : i32
    return %arg0, %c0_i32, %c0_i32_0 : i32, i32, i32
  }
}

</mosaic_0001>

<bundles_post_ra>
// kernel: mae_mlp_forward.1
= control target key start
LH: loop header
LB: loop body
LE: loop exit
PB: predicated region body
PF: predicated region fallthrough
CT: control target
= control target key end

     0   :  { %s607_s0 = inlined_call_operand.vmem [shape: s32[8], index: 0, kind: input, shape index: {}]   ;;  %s608_s1 = inlined_call_operand.vmem [shape: f32[32,1,16], index: 1, kind: input, shape index: {}]   ;;  %s609_s2 = inlined_call_operand.vmem [shape: f32[104,32], index: 2, kind: input, shape index: {}]   ;;  %s610_s3 = inlined_call_operand.vmem [shape: f32[8,1,2], index: 3, kind: output, shape index: {}]  }
   0x1   :  { %s8_s14 = sshll.u32 %s607_s0, 4  ;;  %s9_s14 = int_to_ptr.vmem [resolvable:$true] %s8_s14 }
   0x2   :  { %s496_s15 = scalar_lea.vmem %s9_s14, 16  ;;  %p501_p1 = scmp.lt.s32.totalorder %s9_s14, %s9_s14 }
   0x3   :  { %p497_p0 = scmp.ne.s32.totalorder %s9_s14, %s496_s15  ;;  %p502_p2 = scmp.lt.s32.totalorder %s496_s15, %s496_s15 }
   0x5   :  { %p503_p3 = por %p502_p2, %p501_p1 }
   0x7   :  { %p504_p4 = pnand %p503_p3, %p497_p0 }
   0x9   :  { %507 = shalt.err (!%p504_p4)  }
   0xa   :  { %s518_s16 = smov [#allocation3]  }
   0xb   :  { %11 = dma.vmem_to_smem %s9_s14, 16, %s518_s16, [#allocation2] }
   0xc   :  { %512 = dma.done.wait [#allocation2], 16 }
   0xd   :  { %513 = vsyncadd [#allocation2], 4294967280 }
   0xe   :  { %13 = sfence }
   0xf   :  { %s544_s17 = smov 0  }
  0x10 LB: > { %s550_s0 = sadd.s32 4294967295, %s516_s17   ;;  %p437_p5 = scmp.ge.s32.totalorder %s516_s17, 1  ;;  %s516_s17 = sphi %s544_s17, %s19_s17  }
  0x11   : > { %p121_p6 = scmp.lt.s32.totalorder %s516_s17, 9 }
  0x13   : > { %p122_p7 = pnand %p437_p5, %p121_p6 }
  0x14   : > { %s140_s20 = sld [smem:[#allocation3 + %s550_s0]] (!%p122_p7)  ;;  %p145_p9 = scmp.lt.s32.totalorder (!%p122_p7), %s550_s0, 7 }
  0x15   : > { %125 = sbr.rel (%p122_p7) target bundleno = 625 (0x271), region = 28 }
  0x1a   : > { %v150_v0 = vld [vmem:[%s609_s2 + $0x8] sm:$0xff]  ;;  %v519_v1 = vmov 0.0   ;;  %v149_v2 = vld [vmem:[%s609_s2] sm:$0xff]  ;;  %vm520_vm0 = vmmov 0   ;;  %p141_p8 = scmp.lt.s32.totalorder %s140_s20, 31  ;;  %vm152_vm1 = vcmask 130048  }
  0x1b   : > { %456 = vmatprep.subr.mxu0 %v519_v1  ;;  %460 = vmatprep.mubr.msk.f32.mxu0 %vm520_vm0, %v519_v1  ;;  %v231_v4 = vld [vmem:[%s609_s2 + $0x30] sm:$0xff]  ;;  %v230_v5 = vld [vmem:[%s609_s2 + $0x28] sm:$0xff]  ;;  %v229_v6 = vld [vmem:[%s609_s2 + $0x20] sm:$0xff]  ;;  %vm233_vm2 = vcmask 261120   ;;  %s614_s0 = smov (!%p145_p9, %s550_s0), 7  ;;  %vm387_vm3 = vcmask 8192  }
  0x1c   : > { %457 = vmatpush3.msra.mxu0 %v150_v0  ;;  %463 = vmatprep.subr.mxu1 %v519_v1  ;;  %s612_s20 = smov (!%p141_p8, %s140_s20), 31  ;;  %v228_v7 = vld [vmem:[%s609_s2 + $0x18] sm:$0xff]  ;;  %v151_v8 = vld [vmem:[%s609_s2 + $0x10] sm:$0x1]  ;;  %v310_v16 = vld [vmem:[%s609_s2 + $0x48] sm:$0xff]  ;;  %s147_s24 = scalar_lea.vmem %s610_s3, %s614_s0 }
  0x1d   : > { %458 = vmatprep.subr.mxu0 %v519_v1  ;;  %471 = vmatprep.mubr.msk.f32.mxu1 %vm520_vm0, %v519_v1  ;;  %s143_s25 = scalar_lea.vmem %s608_s1, %s612_s20  ;;  %v312_v14 = vld [vmem:[%s609_s2 + $0x58] sm:$0xff]  ;;  %v311_v15 = vld [vmem:[%s609_s2 + $0x50] sm:$0xff]  ;;  %v309_v17 = vld [vmem:[%s609_s2 + $0x40] sm:$0xff] }
  0x1e   : > { %459 = vmatpush3.msra.mxu0 %v149_v2  ;;  %v148_v3 = vld [vmem:[%s143_s25] sm:$0x1]  ;;  %464 = vmatpush3.msra.mxu1 %v231_v4  ;;  %v232_v18 = vld [vmem:[%s609_s2 + $0x38] sm:$0x1] }
  0x1f   : > { %474 = vmatprep.subr.mxu0 %v519_v1  ;;  %461 = vmatmul.mubr.msk.f32.vlgmr.msra.gmra.mxu0 %vm152_vm1, %v148_v3  ;;  %v313_v24 = vld [vmem:[%s609_s2 + $0x60] sm:$0x1] }
  0x20   : > { %482 = vmatprep.mubr.msk.f32.mxu0 %vm520_vm0, %v519_v1  ;;  %465 = vmatprep.subr.mxu1 %v519_v1 }
  0x21   : > { %466 = vmatpush3.msra.mxu1 %v230_v5  ;;  %475 = vmatpush3.msra.mxu0 %v312_v14 }
  0x22   : > { %467 = vmatprep.subr.mxu1 %v519_v1  ;;  %476 = vmatprep.subr.mxu0 %v519_v1 }
  0x23   : > { %468 = vmatpush3.msra.mxu1 %v229_v6  ;;  %477 = vmatpush3.msra.mxu0 %v311_v15 }
  0x24   : > { %469 = vmatprep.subr.mxu1 %v519_v1  ;;  %478 = vmatprep.subr.mxu0 %v519_v1 }
  0x25   : > { %470 = vmatpush3.msra.mxu1 %v228_v7  ;;  %479 = vmatpush3.msra.mxu0 %v310_v16 }
  0x26   : > { %480 = vmatprep.subr.mxu0 %v519_v1 }
  0x27   : > { %481 = vmatpush3.msra.mxu0 %v309_v17 }
  0xdf   : > { %v222_v9 = vpop.f32.mrf.mxu0 }
  0xe0   : > { %v223_v10 = vadd.f32 %v222_v9, %v151_v8 }
  0xe1   : > { %v462_v11 = vpop.f32.mrf.mxu0 }
  0xe2   : > { %v226_v12 = vmul.f32 0.1, %v223_v10 }
  0xe4   : > { %v227_v13 = vmax.f32 %v223_v10, %v226_v12 }
  0xe6   : > { %472 = vmatmul.mubr.msk.f32.vlgmr.msra.gmra.mxu1 %vm233_vm2, %v227_v13 }
 0x1a6   : > { %v303_v19 = vpop.f32.mrf.mxu1 }
 0x1a7   : > { %v304_v20 = vadd.f32 %v303_v19, %v232_v18 }
 0x1a8   : > { %v473_v21 = vpop.f32.mrf.mxu1 }
 0x1a9   : > { %v307_v22 = vmul.f32 0.1, %v304_v20 }
 0x1ab   : > { %v308_v23 = vmax.f32 %v304_v20, %v307_v22 }
 0x1ad   : > { %483 = vmatmul.mubr.msk.f32.vlgmr.msra.gmra.mxu0 %vm233_vm2, %v308_v23 }
 0x26d   : > { %v383_v25 = vpop.f32.mrf.mxu0 }
 0x26e   : > { %v384_v26 = vadd.f32 %v383_v25, %v313_v24 }
 0x26f   : > { %v484_v27 = vpop.f32.mrf.mxu0 }
 0x270   : > { %388 = vst.msk [vmem:[%s147_s24] sm:$0x1] %vm387_vm3, %v384_v26 }
 0x271 PF: > { %s19_s17 = sadd.s32 1, %s516_s17  }
 0x272   : > { %p16_p10 = scmp.ge.s32.totalorder %s19_s17, 10  }
 0x274   :  { %18 = sbr.rel (!%p16_p10) target bundleno = 16 (0x10), region = 58 }

</bundles_post_ra>
